<compile_context>
chip_gen: v7x
topology: tpu7x:2x2x1
jax: 0.10.0
libtpu: 0.0.40
codegen_flags: <defaults>
</compile_context>

<pallas_src>
import jax
import jax.numpy as jnp
from jax.experimental import pallas as pl
from jax.experimental.pallas import tpu as pltpu

C_IN, C_OUT = 32, 3
H = W = 100
KS = 3
NTAP = KS * KS                 # 9 conv taps


def decoder_kernel(vb_ref, out_ref):
    # vb_ref:  (N, 27) f32 in SMEM; vb_ref[n, o*9 + kh*3 + kw] = sum_c w[o,c,kh,kw] * z[n,c],
    #          with the conv bias folded into the center tap (kh=kw=1, always inside the padding).
    # out_ref: (1, 3, 100, 100) VMEM block = this batch element's full output image (final layout).
    n = pl.program_id(0)

    # Interior masks of the zero-padded conv, generated in-kernel (no mask DMA).
    col = jax.lax.broadcasted_iota(jnp.int32, (1, W), 1)     # output column index, lane axis
    row = jax.lax.broadcasted_iota(jnp.int32, (H, 1), 0)     # output row index, sublane axis
    cl = (col >= 1).astype(jnp.float32)                      # kw = 0 taps land inside
    cr = (col <= W - 2).astype(jnp.float32)                  # kw = 2 taps land inside
    rt = (row >= 1).astype(jnp.float32)                      # kh = 0 taps land inside
    rb = (row <= H - 2).astype(jnp.float32)                  # kh = 2 taps land inside

    for o in range(C_OUT):
        t = o * NTAP
        # Column profiles (1, W): contribution of each kernel row as a function of the output column.
        a_top = cl * vb_ref[n, t + 0] + vb_ref[n, t + 1] + cr * vb_ref[n, t + 2]   # kh = 0
        a_mid = cl * vb_ref[n, t + 3] + vb_ref[n, t + 4] + cr * vb_ref[n, t + 5]   # kh = 1 (+bias)
        a_bot = cl * vb_ref[n, t + 6] + vb_ref[n, t + 7] + cr * vb_ref[n, t + 8]   # kh = 2
        # Rank-1 combine over rows: (H,1) x (1,W) broadcasts -> (H, W); one dense store per channel.
        out_ref[0, o] = rt * a_top + a_mid + rb * a_bot


def autoencoder_forward(x, w, b):
    # encoder is an empty nn.Sequential -> identity; z = x.view(-1, 32)
    z = x.reshape(-1, C_IN)
    N = z.shape[0]

    # Hoisted per-tap responses (tiny: N x 27): V[n, o, s] = sum_c w[o, c, kh, kw] * z[n, c];
    # bias folded into the center tap, which is valid at every output pixel.
    w_os = w.astype(jnp.float32).reshape(C_OUT, C_IN, NTAP)
    v = jnp.einsum("nc,ocs->nos", z.astype(jnp.float32), w_os)              # (N, 3, 9)
    v = v.at[:, :, (KS // 2) * KS + (KS // 2)].add(b.astype(jnp.float32))
    vb = v.reshape(N, C_OUT * NTAP)                                          # (N, 27), lives in SMEM

    y_prim = pl.pallas_call(
        decoder_kernel,
        out_shape=jax.ShapeDtypeStruct((N, C_OUT, H, W), jnp.float32),
        grid=(N,),
        in_specs=[pl.BlockSpec(memory_space=pltpu.MemorySpace.SMEM)],        # tiny scalar table, no VMEM DMA
        out_specs=pl.BlockSpec((1, C_OUT, H, W), lambda n: (n, 0, 0, 0)),
        compiler_params=pltpu.CompilerParams(dimension_semantics=("parallel",)),
    )(vb)
    return y_prim, z


if __name__ == "__main__":
    key = jax.random.PRNGKey(0)
    kx, kw, kb = jax.random.split(key, 3)

    # input implied by the forward: latent-like NCHW tensor whose elements group into (-1, 32)
    x = jax.random.normal(kx, (2, C_IN, 1, 1), jnp.float32)

    # deterministic Conv2d(32, 3, 3) parameters (PyTorch-style uniform fan-in init)
    fan_in = C_IN * KS * KS
    bound = 1.0 / (fan_in ** 0.5)
    w = jax.random.uniform(kw, (C_OUT, C_IN, KS, KS), jnp.float32, -bound, bound)
    b = jax.random.uniform(kb, (C_OUT,), jnp.float32, -bound, bound)

    y_prim, z = jax.jit(autoencoder_forward)(x, w, b)
    jax.block_until_ready((y_prim, z))

    # pure-JAX reference of the same forward pass
    z_ref = x.reshape(-1, C_IN)
    up = jnp.broadcast_to(z_ref[:, :, None, None], (z_ref.shape[0], C_IN, H, W))
    y_ref = jax.lax.conv_general_dilated(
        up, w, window_strides=(1, 1), padding=((1, 1), (1, 1)),
        dimension_numbers=("NCHW", "OIHW", "NCHW")) + b.reshape(1, C_OUT, 1, 1)

    assert y_prim.shape == (2, C_OUT, H, W) and z.shape == (2, C_IN)
    assert jnp.allclose(z, z_ref)
    assert jnp.allclose(y_prim, y_ref, atol=1e-3, rtol=1e-3)
    print("KERNEL_OK")
</pallas_src>

<mosaic_0001>
module attributes {stable_mosaic.version = 11 : i64} {
  func.func @decoder_kernel(%arg0: i32, %arg1: memref<2x27xf32, #tpu.memory_space<smem>>, %arg2: memref<1x3x100x100xf32, #tpu.memory_space<vmem>>) attributes {dimension_semantics = [#tpu.dimension_semantics<parallel>], iteration_bounds = array<i64: 2>, scalar_prefetch = 0 : i64, scratch_operands = 0 : i64, tpu.core_type = #tpu.core_type<tc>, window_params = [{transform_indices = @transform_0, window_bounds = array<i64: 2, 27>}, {transform_indices = @transform_1, window_bounds = array<i64: 1, 3, 100, 100>}]} {
    %0 = tpu.iota {dimensions = array<i32: 1>} : vector<1x100xi32>
    %1 = tpu.iota {dimensions = array<i32: 0>} : vector<100x1xi32>
    %c1_i32 = arith.constant 1 : i32
    %2 = vector.broadcast %c1_i32 : i32 to vector<1x100xi32>
    %3 = arith.cmpi sge, %0, %2 : vector<1x100xi32>
    %4 = arith.extui %3 : vector<1x100xi1> to vector<1x100xi32>
    %5 = arith.sitofp %4 : vector<1x100xi32> to vector<1x100xf32>
    %c98_i32 = arith.constant 98 : i32
    %6 = vector.broadcast %c98_i32 : i32 to vector<1x100xi32>
    %7 = arith.cmpi sle, %0, %6 : vector<1x100xi32>
    %8 = arith.extui %7 : vector<1x100xi1> to vector<1x100xi32>
    %9 = arith.sitofp %8 : vector<1x100xi32> to vector<1x100xf32>
    %c1_i32_0 = arith.constant 1 : i32
    %10 = vector.broadcast %c1_i32_0 : i32 to vector<100x1xi32>
    %11 = arith.cmpi sge, %1, %10 : vector<100x1xi32>
    %12 = arith.extui %11 : vector<100x1xi1> to vector<100x1xi32>
    %13 = arith.sitofp %12 : vector<100x1xi32> to vector<100x1xf32>
    %c98_i32_1 = arith.constant 98 : i32
    %14 = vector.broadcast %c98_i32_1 : i32 to vector<100x1xi32>
    %15 = arith.cmpi sle, %1, %14 : vector<100x1xi32>
    %16 = arith.extui %15 : vector<100x1xi1> to vector<100x1xi32>
    %17 = arith.sitofp %16 : vector<100x1xi32> to vector<100x1xf32>
    %18 = arith.index_cast %arg0 : i32 to index
    %c0 = arith.constant 0 : index
    %19 = memref.load %arg1[%18, %c0] : memref<2x27xf32, #tpu.memory_space<smem>>
    %20 = vector.broadcast %19 : f32 to vector<1x100xf32>
    %21 = arith.mulf %5, %20 : vector<1x100xf32>
    %22 = arith.index_cast %arg0 : i32 to index
    %c1 = arith.constant 1 : index
    %23 = memref.load %arg1[%22, %c1] : memref<2x27xf32, #tpu.memory_space<smem>>
    %24 = vector.broadcast %23 : f32 to vector<1x100xf32>
    %25 = arith.addf %21, %24 : vector<1x100xf32>
    %26 = arith.index_cast %arg0 : i32 to index
    %c2 = arith.constant 2 : index
    %27 = memref.load %arg1[%26, %c2] : memref<2x27xf32, #tpu.memory_space<smem>>
    %28 = vector.broadcast %27 : f32 to vector<1x100xf32>
    %29 = arith.mulf %9, %28 : vector<1x100xf32>
    %30 = arith.addf %25, %29 : vector<1x100xf32>
    %31 = arith.index_cast %arg0 : i32 to index
    %c3 = arith.constant 3 : index
    %32 = memref.load %arg1[%31, %c3] : memref<2x27xf32, #tpu.memory_space<smem>>
    %33 = vector.broadcast %32 : f32 to vector<1x100xf32>
    %34 = arith.mulf %5, %33 : vector<1x100xf32>
    %35 = arith.index_cast %arg0 : i32 to index
    %c4 = arith.constant 4 : index
    %36 = memref.load %arg1[%35, %c4] : memref<2x27xf32, #tpu.memory_space<smem>>
    %37 = vector.broadcast %36 : f32 to vector<1x100xf32>
    %38 = arith.addf %34, %37 : vector<1x100xf32>
    %39 = arith.index_cast %arg0 : i32 to index
    %c5 = arith.constant 5 : index
    %40 = memref.load %arg1[%39, %c5] : memref<2x27xf32, #tpu.memory_space<smem>>
    %41 = vector.broadcast %40 : f32 to vector<1x100xf32>
    %42 = arith.mulf %9, %41 : vector<1x100xf32>
    %43 = arith.addf %38, %42 : vector<1x100xf32>
    %44 = arith.index_cast %arg0 : i32 to index
    %c6 = arith.constant 6 : index
    %45 = memref.load %arg1[%44, %c6] : memref<2x27xf32, #tpu.memory_space<smem>>
    %46 = vector.broadcast %45 : f32 to vector<1x100xf32>
    %47 = arith.mulf %5, %46 : vector<1x100xf32>
    %48 = arith.index_cast %arg0 : i32 to index
    %c7 = arith.constant 7 : index
    %49 = memref.load %arg1[%48, %c7] : memref<2x27xf32, #tpu.memory_space<smem>>
    %50 = vector.broadcast %49 : f32 to vector<1x100xf32>
    %51 = arith.addf %47, %50 : vector<1x100xf32>
    %52 = arith.index_cast %arg0 : i32 to index
    %c8 = arith.constant 8 : index
    %53 = memref.load %arg1[%52, %c8] : memref<2x27xf32, #tpu.memory_space<smem>>
    %54 = vector.broadcast %53 : f32 to vector<1x100xf32>
    %55 = arith.mulf %9, %54 : vector<1x100xf32>
    %56 = arith.addf %51, %55 : vector<1x100xf32>
    %57 = vector.broadcast %13 : vector<100x1xf32> to vector<100x100xf32>
    %58 = vector.broadcast %30 : vector<1x100xf32> to vector<100x100xf32>
    %59 = arith.mulf %57, %58 : vector<100x100xf32>
    %60 = vector.broadcast %43 : vector<1x100xf32> to vector<100x100xf32>
    %61 = arith.addf %59, %60 : vector<100x100xf32>
    %62 = vector.broadcast %17 : vector<100x1xf32> to vector<100x100xf32>
    %63 = vector.broadcast %56 : vector<1x100xf32> to vector<100x100xf32>
    %64 = arith.mulf %62, %63 : vector<100x100xf32>
    %65 = arith.addf %61, %64 : vector<100x100xf32>
    %c0_2 = arith.constant 0 : index
    %c0_3 = arith.constant 0 : index
    %c0_4 = arith.constant 0 : index
    %c0_5 = arith.constant 0 : index
    %66 = vector.load %arg2[%c0_2, %c0_3, %c0_4, %c0_5] : memref<1x3x100x100xf32, #tpu.memory_space<vmem>>, vector<1x1x100x100xf32>
    %67 = vector.shape_cast %66 : vector<1x1x100x100xf32> to vector<100x100xf32>
    %68 = vector.shape_cast %65 : vector<100x100xf32> to vector<1x1x100x100xf32>
    tpu.vector_store %arg2[%c0_2, %c0_3, %c0_4, %c0_5], %68 {strides = array<i32>} : memref<1x3x100x100xf32, #tpu.memory_space<vmem>>, vector<1x1x100x100xf32>,
    %69 = arith.index_cast %arg0 : i32 to index
    %c9 = arith.constant 9 : index
    %70 = memref.load %arg1[%69, %c9] : memref<2x27xf32, #tpu.memory_space<smem>>
    %71 = vector.broadcast %70 : f32 to vector<1x100xf32>
    %72 = arith.mulf %5, %71 : vector<1x100xf32>
    %73 = arith.index_cast %arg0 : i32 to index
    %c10 = arith.constant 10 : index
    %74 = memref.load %arg1[%73, %c10] : memref<2x27xf32, #tpu.memory_space<smem>>
    %75 = vector.broadcast %74 : f32 to vector<1x100xf32>
    %76 = arith.addf %72, %75 : vector<1x100xf32>
    %77 = arith.index_cast %arg0 : i32 to index
    %c11 = arith.constant 11 : index
    %78 = memref.load %arg1[%77, %c11] : memref<2x27xf32, #tpu.memory_space<smem>>
    %79 = vector.broadcast %78 : f32 to vector<1x100xf32>
    %80 = arith.mulf %9, %79 : vector<1x100xf32>
    %81 = arith.addf %76, %80 : vector<1x100xf32>
    %82 = arith.index_cast %arg0 : i32 to index
    %c12 = arith.constant 12 : index
    %83 = memref.load %arg1[%82, %c12] : memref<2x27xf32, #tpu.memory_space<smem>>
    %84 = vector.broadcast %83 : f32 to vector<1x100xf32>
    %85 = arith.mulf %5, %84 : vector<1x100xf32>
    %86 = arith.index_cast %arg0 : i32 to index
    %c13 = arith.constant 13 : index
    %87 = memref.load %arg1[%86, %c13] : memref<2x27xf32, #tpu.memory_space<smem>>
    %88 = vector.broadcast %87 : f32 to vector<1x100xf32>
    %89 = arith.addf %85, %88 : vector<1x100xf32>
    %90 = arith.index_cast %arg0 : i32 to index
    %c14 = arith.constant 14 : index
    %91 = memref.load %arg1[%90, %c14] : memref<2x27xf32, #tpu.memory_space<smem>>
    %92 = vector.broadcast %91 : f32 to vector<1x100xf32>
    %93 = arith.mulf %9, %92 : vector<1x100xf32>
    %94 = arith.addf %89, %93 : vector<1x100xf32>
    %95 = arith.index_cast %arg0 : i32 to index
    %c15 = arith.constant 15 : index
    %96 = memref.load %arg1[%95, %c15] : memref<2x27xf32, #tpu.memory_space<smem>>
    %97 = vector.broadcast %96 : f32 to vector<1x100xf32>
    %98 = arith.mulf %5, %97 : vector<1x100xf32>
    %99 = arith.index_cast %arg0 : i32 to index
    %c16 = arith.constant 16 : index
    %100 = memref.load %arg1[%99, %c16] : memref<2x27xf32, #tpu.memory_space<smem>>
    %101 = vector.broadcast %100 : f32 to vector<1x100xf32>
    %102 = arith.addf %98, %101 : vector<1x100xf32>
    %103 = arith.index_cast %arg0 : i32 to index
    %c17 = arith.constant 17 : index
    %104 = memref.load %arg1[%103, %c17] : memref<2x27xf32, #tpu.memory_space<smem>>
    %105 = vector.broadcast %104 : f32 to vector<1x100xf32>
    %106 = arith.mulf %9, %105 : vector<1x100xf32>
    %107 = arith.addf %102, %106 : vector<1x100xf32>
    %108 = vector.broadcast %13 : vector<100x1xf32> to vector<100x100xf32>
    %109 = vector.broadcast %81 : vector<1x100xf32> to vector<100x100xf32>
    %110 = arith.mulf %108, %109 : vector<100x100xf32>
    %111 = vector.broadcast %94 : vector<1x100xf32> to vector<100x100xf32>
    %112 = arith.addf %110, %111 : vector<100x100xf32>
    %113 = vector.broadcast %17 : vector<100x1xf32> to vector<100x100xf32>
    %114 = vector.broadcast %107 : vector<1x100xf32> to vector<100x100xf32>
    %115 = arith.mulf %113, %114 : vector<100x100xf32>
    %116 = arith.addf %112, %115 : vector<100x100xf32>
    %c0_6 = arith.constant 0 : index
    %c1_7 = arith.constant 1 : index
    %c0_8 = arith.constant 0 : index
    %c0_9 = arith.constant 0 : index
    %117 = vector.load %arg2[%c0_6, %c1_7, %c0_8, %c0_9] : memref<1x3x100x100xf32, #tpu.memory_space<vmem>>, vector<1x1x100x100xf32>
    %118 = vector.shape_cast %117 : vector<1x1x100x100xf32> to vector<100x100xf32>
    %119 = vector.shape_cast %116 : vector<100x100xf32> to vector<1x1x100x100xf32>
    tpu.vector_store %arg2[%c0_6, %c1_7, %c0_8, %c0_9], %119 {strides = array<i32>} : memref<1x3x100x100xf32, #tpu.memory_space<vmem>>, vector<1x1x100x100xf32>,
    %120 = arith.index_cast %arg0 : i32 to index
    %c18 = arith.constant 18 : index
    %121 = memref.load %arg1[%120, %c18] : memref<2x27xf32, #tpu.memory_space<smem>>
    %122 = vector.broadcast %121 : f32 to vector<1x100xf32>
    %123 = arith.mulf %5, %122 : vector<1x100xf32>
    %124 = arith.index_cast %arg0 : i32 to index
    %c19 = arith.constant 19 : index
    %125 = memref.load %arg1[%124, %c19] : memref<2x27xf32, #tpu.memory_space<smem>>
    %126 = vector.broadcast %125 : f32 to vector<1x100xf32>
    %127 = arith.addf %123, %126 : vector<1x100xf32>
    %128 = arith.index_cast %arg0 : i32 to index
    %c20 = arith.constant 20 : index
    %129 = memref.load %arg1[%128, %c20] : memref<2x27xf32, #tpu.memory_space<smem>>
    %130 = vector.broadcast %129 : f32 to vector<1x100xf32>
    %131 = arith.mulf %9, %130 : vector<1x100xf32>
    %132 = arith.addf %127, %131 : vector<1x100xf32>
    %133 = arith.index_cast %arg0 : i32 to index
    %c21 = arith.constant 21 : index
    %134 = memref.load %arg1[%133, %c21] : memref<2x27xf32, #tpu.memory_space<smem>>
    %135 = vector.broadcast %134 : f32 to vector<1x100xf32>
    %136 = arith.mulf %5, %135 : vector<1x100xf32>
    %137 = arith.index_cast %arg0 : i32 to index
    %c22 = arith.constant 22 : index
    %138 = memref.load %arg1[%137, %c22] : memref<2x27xf32, #tpu.memory_space<smem>>
    %139 = vector.broadcast %138 : f32 to vector<1x100xf32>
    %140 = arith.addf %136, %139 : vector<1x100xf32>
    %141 = arith.index_cast %arg0 : i32 to index
    %c23 = arith.constant 23 : index
    %142 = memref.load %arg1[%141, %c23] : memref<2x27xf32, #tpu.memory_space<smem>>
    %143 = vector.broadcast %142 : f32 to vector<1x100xf32>
    %144 = arith.mulf %9, %143 : vector<1x100xf32>
    %145 = arith.addf %140, %144 : vector<1x100xf32>
    %146 = arith.index_cast %arg0 : i32 to index
    %c24 = arith.constant 24 : index
    %147 = memref.load %arg1[%146, %c24] : memref<2x27xf32, #tpu.memory_space<smem>>
    %148 = vector.broadcast %147 : f32 to vector<1x100xf32>
    %149 = arith.mulf %5, %148 : vector<1x100xf32>
    %150 = arith.index_cast %arg0 : i32 to index
    %c25 = arith.constant 25 : index
    %151 = memref.load %arg1[%150, %c25] : memref<2x27xf32, #tpu.memory_space<smem>>
    %152 = vector.broadcast %151 : f32 to vector<1x100xf32>
    %153 = arith.addf %149, %152 : vector<1x100xf32>
    %154 = arith.index_cast %arg0 : i32 to index
    %c26 = arith.constant 26 : index
    %155 = memref.load %arg1[%154, %c26] : memref<2x27xf32, #tpu.memory_space<smem>>
    %156 = vector.broadcast %155 : f32 to vector<1x100xf32>
    %157 = arith.mulf %9, %156 : vector<1x100xf32>
    %158 = arith.addf %153, %157 : vector<1x100xf32>
    %159 = vector.broadcast %13 : vector<100x1xf32> to vector<100x100xf32>
    %160 = vector.broadcast %132 : vector<1x100xf32> to vector<100x100xf32>
    %161 = arith.mulf %159, %160 : vector<100x100xf32>
    %162 = vector.broadcast %145 : vector<1x100xf32> to vector<100x100xf32>
    %163 = arith.addf %161, %162 : vector<100x100xf32>
    %164 = vector.broadcast %17 : vector<100x1xf32> to vector<100x100xf32>
    %165 = vector.broadcast %158 : vector<1x100xf32> to vector<100x100xf32>
    %166 = arith.mulf %164, %165 : vector<100x100xf32>
    %167 = arith.addf %163, %166 : vector<100x100xf32>
    %c0_10 = arith.constant 0 : index
    %c2_11 = arith.constant 2 : index
    %c0_12 = arith.constant 0 : index
    %c0_13 = arith.constant 0 : index
    %168 = vector.load %arg2[%c0_10, %c2_11, %c0_12, %c0_13] : memref<1x3x100x100xf32, #tpu.memory_space<vmem>>, vector<1x1x100x100xf32>
    %169 = vector.shape_cast %168 : vector<1x1x100x100xf32> to vector<100x100xf32>
    %170 = vector.shape_cast %167 : vector<100x100xf32> to vector<1x1x100x100xf32>
    tpu.vector_store %arg2[%c0_10, %c2_11, %c0_12, %c0_13], %170 {strides = array<i32>} : memref<1x3x100x100xf32, #tpu.memory_space<vmem>>, vector<1x1x100x100xf32>,
    return
  }
  func.func @transform_0(%arg0: i32) -> (i32, i32) {
    %c0_i32 = arith.constant 0 : i32
    %c0_i32_0 = arith.constant 0 : i32
    %c0_i32_1 = arith.constant 0 : i32
    return %c0_i32, %c0_i32_0 : i32, i32
  }
  func.func @transform_1(%arg0: i32) -> (i32, i32, i32, i32) {
    %c0_i32 = arith.constant 0 : i32
    %c0_i32_0 = arith.constant 0 : i32
    %c0_i32_1 = arith.constant 0 : i32
    %c0_i32_2 = arith.constant 0 : i32
    return %arg0, %c0_i32, %c0_i32_0, %c0_i32_1 : i32, i32, i32, i32
  }
}

</mosaic_0001>

<bundles_post_ra>
// kernel: autoencoder_forward.1
= control target key start
LH: loop header
LB: loop body
LE: loop exit
PB: predicated region body
PF: predicated region fallthrough
CT: control target
= control target key end

     0   :  { %6 = vsyncpa [#allocation3], 0  ;;  %s682_s6 = smov 0   ;;  %s921_s0 = inlined_call_operand.vmem [shape: f32[2,27], index: 0, kind: input, shape index: {}]   ;;  %s922_s1 = inlined_call_operand.vmem [shape: f32[2,3,100,100], index: 1, kind: output, shape index: {}]  }
   0x1 LB: > { %s688_s7 = sadd.s32 4294967295, %s668_s6   ;;  %p584_p0 = scmp.ge.s32.totalorder %s668_s6, 1  ;;  %s668_s6 = sphi %s682_s6, %s12_s6  }
   0x2   : > { %p64_p1 = scmp.lt.s32.totalorder %s668_s6, 3  ;;  %s77_s10 = sshll.u32 %s921_s0, 4  ;;  %s78_s10 = int_to_ptr.vmem [resolvable:$true] %s77_s10 }
   0x3   : > { %p631_p3 = scmp.eq.s32.totalorder %s688_s7, 0  ;;  %s643_s12 = scalar_lea.vmem %s78_s10, 32 }
   0x4   : > { %p695_p2 = pnand %p584_p0, %p64_p1  ;;  %p644_p6 = scmp.ne.s32.totalorder %s78_s10, %s643_s12 }
   0x5   : > { %p651_p10 = scmp.lt.s32.totalorder %s78_s10, %s78_s10  ;;  %p652_p11 = scmp.lt.s32.totalorder %s643_s12, %s643_s12 }
   0x6   : > { %p627_p4 = pneg %p695_p2 }
   0x7   : > { %p653_p12 = por %p652_p11, %p651_p10 }
   0x8   : > { %p628_p5 = pnand %p631_p3, %p627_p4 }
   0xa   : > { %p645_p7 = pneg %p628_p5 }
   0xc   : > { %p646_p8 = pnand %p645_p7, %p644_p6 }
   0xe   : > { %p647_p9 = pneg %p646_p8 }
  0x10   : > { %p654_p13 = pnand %p653_p12, %p647_p9 }
  0x12   : > { %657 = shalt.err (!%p654_p13)
}
  0x13   : > { %s670_s13 = smov [#allocation2]   ;;  %90 = sbr.rel (%p695_p2) target bundleno = 78 (0x4e), region = 24 }
  0x14   : > { %630 = dma.vmem_to_smem (!%p628_p5), %s78_s10, 32, %s670_s13, [#allocation3]  }
  0x1a   : > { %663 = dma.done.wait (%p631_p3), [#allocation3], 32  }
  0x1b   : > { %665 = vsyncadd (%p631_p3), [#allocation3], 4294967264 }
  0x1c   : > { %96 = sfence }
  0x1d   : > { %p106_p0 = scmp.lt.s32.totalorder %s688_s7, 1  ;;  %v111_v0 = vlaneseq  ;;  %s712_s14 = sshll.u32 %s688_s7, 7  ;;  %v671_v3 = vmov 0.0   ;;  %vm302_vm4 = vcmask 818176   ;;  %vm315_vm5 = vcmask 814080  }
  0x1e   : > { %s212_s15 = sld [smem:[#allocation2 + %s712_s14]]  ;;  %s215_s16 = sadd.s32 1, %s712_s14 }
  0x1f   : > { %s925_s7 = smov (!%p106_p0, %s688_s7), 1  ;;  %v112_v1 = vand.u32 127, %v111_v0  ;;  %s216_s17 = sld [smem:[#allocation2 + %s215_s16]]  ;;  %v114_v2 = vshrl.u32 %v111_v0, 7 }
  0x20   : > { %s219_s18 = sadd.s32 2, %s712_s14  ;;  %s622_s19 = smul.u32 312, %s925_s7 }
  0x21   : > { %vm127_vm0 = vcmp.ge.s32.totalorder %v112_v1, 1  ;;  %s220_s20 = sld [smem:[#allocation2 + %s219_s18]]  ;;  %vm130_vm1 = vcmp.le.s32.totalorder %v112_v1, 98  ;;  %s224_s21 = sadd.s32 3, %s712_s14  ;;  %vm133_vm2 = vcmp.ge.s32.totalorder %v114_v2, 1  ;;  %v126_v11 = vadd.s32 96, %v114_v2 }
  0x22   : > { %v718_v4 = vsel %vm127_vm0, 1.0, %v671_v3  ;;  %s228_s22 = sadd.s32 4, %s712_s14  ;;  %s725_s25 = scalar_lea.vmem %s922_s1, %s622_s19  ;;  %v730_v6 = vsel %vm130_vm1, 1.0, %v671_v3  ;;  %v740_v13 = vsel %vm133_vm2, 1.0, %v671_v3 }
  0x23   : > { %s225_s26 = sld [smem:[#allocation2 + %s224_s21]]  ;;  %s232_s28 = sadd.s32 5, %s712_s14  ;;  %vm184_vm3 = vcmp.le.s32.totalorder %v126_v11, 98 }
  0x24   : > { %v213_v5 = vstv %s212_s15  ;;  %s727_s27 = sld [smem:[#allocation2 + %s228_s22]]  ;;  %s237_s30 = sadd.s32 6, %s712_s14  ;;  %v768_v29 = vsel %vm184_vm3, 1.0, %v671_v3 }
  0x25   : > { %v214_v7 = vmul.f32 %v718_v4, %v213_v5  ;;  %s233_s29 = sld [smem:[#allocation2 + %s232_s28]]  ;;  %v217_v8 = vstv %s216_s17  ;;  %s241_s3 = sadd.s32 7, %s712_s14 }
  0x26   : > { %s238_s2 = sld [smem:[#allocation2 + %s237_s30]]  ;;  %s245_s5 = sadd.s32 8, %s712_s14 }
  0x27   : > { %v218_v9 = vadd.f32 %v217_v8, %v214_v7  ;;  %v221_v10 = vstv %s220_s20  ;;  %s735_s4 = sld [smem:[#allocation2 + %s241_s3]]  ;;  %s317_s8 = sadd.s32 9, %s712_s14 }
  0x28   : > { %v222_v12 = vmul.f32 %v730_v6, %v221_v10  ;;  %s246_s7 = sld [smem:[#allocation2 + %s245_s5]]  ;;  %s321_s10 = sadd.s32 10, %s712_s14 }
  0x29   : > { %v226_v14 = vstv %s225_s26  ;;  %s742_s9 = sld [smem:[#allocation2 + %s317_s8]]  ;;  %s325_s12 = sadd.s32 11, %s712_s14 }
  0x2a   : > { %v223_v15 = vadd.f32 %v222_v12, %v218_v9  ;;  %v227_v16 = vmul.f32 %v718_v4, %v226_v14  ;;  %v230_v17 = vstv %s727_s27  ;;  %s747_s11 = sld [smem:[#allocation2 + %s321_s10]]  ;;  %s330_s15 = sadd.s32 12, %s712_s14 }
  0x2b   : > { %v234_v18 = vstv %s233_s29  ;;  %s750_s13 = sld [smem:[#allocation2 + %s325_s12]]  ;;  %s334_s17 = sadd.s32 13, %s712_s14 }
  0x2c   : > { %v231_v19 = vadd.f32 %v230_v17, %v227_v16  ;;  %v235_v20 = vmul.f32 %v730_v6, %v234_v18  ;;  %v239_v21 = vstv %s238_s2  ;;  %v250_v22 = vmul.f32 %v740_v13, %v223_v15  ;;  %s755_s16 = sld [smem:[#allocation2 + %s330_s15]]  ;;  %s338_s19 = sadd.s32 14, %s712_s14 }
  0x2d   : > { %v240_v23 = vmul.f32 %v718_v4, %v239_v21  ;;  %v243_v24 = vstv %s735_s4  ;;  %s760_s18 = sld [smem:[#allocation2 + %s334_s17]]  ;;  %s343_s21 = sadd.s32 15, %s712_s14 }
  0x2e   : > { %v236_v25 = vadd.f32 %v235_v20, %v231_v19  ;;  %v247_v26 = vstv %s246_s7  ;;  %s763_s20 = sld [smem:[#allocation2 + %s338_s19]]  ;;  %s347_s23 = sadd.s32 16, %s712_s14 }
  0x2f   : > { %v244_v27 = vadd.f32 %v243_v24, %v240_v23  ;;  %v248_v28 = vmul.f32 %v730_v6, %v247_v26  ;;  %v319_v30 = vstv %s742_s9  ;;  %s771_s22 = sld [smem:[#allocation2 + %s343_s21]]  ;;  %s351_s26 = sadd.s32 17, %s712_s14 }
  0x30   : > { %v263_v31 = vadd.f32 %v250_v22, %v236_v25  ;;  %v264_v32 = vadd.f32 %v236_v25, %v223_v15  ;;  %v320_v33 = vmul.f32 %v718_v4, %v319_v30  ;;  %v323_v34 = vstv %s747_s11  ;;  %s776_s24 = sld [smem:[#allocation2 + %s347_s23]]  ;;  %s422_s28 = sadd.s32 18, %s712_s14 }
  0x31   : > { %v249_v35 = vadd.f32 %v248_v28, %v244_v27  ;;  %v327_v36 = vstv %s750_s13  ;;  %s780_s27 = sld [smem:[#allocation2 + %s351_s26]]  ;;  %s426_s30 = sadd.s32 19, %s712_s14 }
  0x32   : > { %v324_v37 = vadd.f32 %v323_v34, %v320_v33  ;;  %v328_v38 = vmul.f32 %v730_v6, %v327_v36  ;;  %v332_v39 = vstv %s755_s16  ;;  %s785_s29 = sld [smem:[#allocation2 + %s422_s28]]  ;;  %s430_s3 = sadd.s32 20, %s712_s14 }
  0x33   : > { %v289_v40 = vadd.f32 %v263_v31, %v249_v35  ;;  %v290_v41 = vadd.f32 %v264_v32, %v249_v35  ;;  %v288_v42 = vmul.f32 %v768_v29, %v249_v35  ;;  %v333_v43 = vmul.f32 %v718_v4, %v332_v39  ;;  %s790_s2 = sld [smem:[#allocation2 + %s426_s30]]  ;;  %s435_s5 = sadd.s32 21, %s712_s14 }
  0x34   : > { %v329_v44 = vadd.f32 %v328_v38, %v324_v37  ;;  %v336_v45 = vstv %s760_s18  ;;  %v340_v46 = vstv %s763_s20  ;;  %s795_s4 = sld [smem:[#allocation2 + %s430_s3]]  ;;  %s439_s8 = sadd.s32 22, %s712_s14 }
  0x35   : > { %303 = vst.msk [vmem:[%s725_s25] sm:$0xff] %vm302_vm4, %v289_v40  ;;  %304 = vst.msk [vmem:[%s725_s25 + $0x8] sm:$0xff] %vm302_vm4, %v290_v41  ;;  %v301_v47 = vadd.f32 %v288_v42, %v264_v32  ;;  %v337_v48 = vadd.f32 %v336_v45, %v333_v43  ;;  %v341_v49 = vmul.f32 %v730_v6, %v340_v46  ;;  %v345_v50 = vstv %s771_s22  ;;  %s824_s7 = sld [smem:[#allocation2 + %s435_s5]]  ;;  %s443_s10 = sadd.s32 23, %s712_s14 }
  0x36   : > { %305 = vst.msk [vmem:[%s725_s25 + $0x10] sm:$0xff] %vm302_vm4, %v290_v41  ;;  %306 = vst.msk [vmem:[%s725_s25 + $0x18] sm:$0xff] %vm302_vm4, %v290_v41  ;;  %v346_v51 = vmul.f32 %v718_v4, %v345_v50  ;;  %v349_v52 = vstv %s776_s24  ;;  %v356_v53 = vmul.f32 %v740_v13, %v329_v44  ;;  %s830_s9 = sld [smem:[#allocation2 + %s439_s8]]  ;;  %s448_s12 = sadd.s32 24, %s712_s14 }
  0x37   : > { %307 = vst.msk [vmem:[%s725_s25 + $0x20] sm:$0xff] %vm302_vm4, %v290_v41  ;;  %308 = vst.msk [vmem:[%s725_s25 + $0x28] sm:$0xff] %vm302_vm4, %v290_v41  ;;  %v342_v54 = vadd.f32 %v341_v49, %v337_v48  ;;  %v353_v55 = vstv %s780_s27  ;;  %s836_s11 = sld [smem:[#allocation2 + %s443_s10]]  ;;  %s452_s15 = sadd.s32 25, %s712_s14 }
  0x38   : > { %309 = vst.msk [vmem:[%s725_s25 + $0x30] sm:$0xff] %vm302_vm4, %v290_v41  ;;  %310 = vst.msk [vmem:[%s725_s25 + $0x38] sm:$0xff] %vm302_vm4, %v290_v41  ;;  %v350_v56 = vadd.f32 %v349_v52, %v346_v51  ;;  %v354_v57 = vmul.f32 %v730_v6, %v353_v55  ;;  %v424_v58 = vstv %s785_s29  ;;  %s841_s13 = sld [smem:[#allocation2 + %s448_s12]]  ;;  %s456_s17 = sadd.s32 26, %s712_s14 }
  0x39   : > { %311 = vst.msk [vmem:[%s725_s25 + $0x40] sm:$0xff] %vm302_vm4, %v290_v41  ;;  %312 = vst.msk [vmem:[%s725_s25 + $0x48] sm:$0xff] %vm302_vm4, %v290_v41  ;;  %v369_v59 = vadd.f32 %v356_v53, %v342_v54  ;;  %v370_v60 = vadd.f32 %v342_v54, %v329_v44  ;;  %v425_v61 = vmul.f32 %v718_v4, %v424_v58  ;;  %v428_v62 = vstv %s790_s2  ;;  %s846_s16 = sld [smem:[#allocation2 + %s452_s15]] }
  0x3a   : > { %313 = vst.msk [vmem:[%s725_s25 + $0x50] sm:$0xff] %vm302_vm4, %v290_v41  ;;  %314 = vst.msk [vmem:[%s725_s25 + $0x58] sm:$0xff] %vm302_vm4, %v290_v41  ;;  %v355_v63 = vadd.f32 %v354_v57, %v350_v56  ;;  %v432_v0 = vstv %s795_s4  ;;  %s850_s18 = sld [smem:[#allocation2 + %s456_s17]] }
  0x3b   : > { %316 = vst.msk [vmem:[%s725_s25 + $0x60] sm:$0xf] %vm315_vm5, %v301_v47  ;;  %v429_v1 = vadd.f32 %v428_v62, %v425_v61  ;;  %v433_v2 = vmul.f32 %v730_v6, %v432_v0  ;;  %v437_v3 = vstv %s824_s7 }
  0x3c   : > { %v395_v5 = vadd.f32 %v369_v59, %v355_v63  ;;  %v396_v7 = vadd.f32 %v370_v60, %v355_v63  ;;  %v394_v8 = vmul.f32 %v768_v29, %v355_v63  ;;  %v438_v9 = vmul.f32 %v718_v4, %v437_v3 }
  0x3d   : > { %v434_v10 = vadd.f32 %v433_v2, %v429_v1  ;;  %v441_v11 = vstv %s830_s9  ;;  %v445_v12 = vstv %s836_s11 }
  0x3e   : > { %594 = vst.msk [vmem:[%s725_s25 + $0x68] sm:$0xff] %vm302_vm4, %v395_v5  ;;  %595 = vst.msk [vmem:[%s725_s25 + $0x70] sm:$0xff] %vm302_vm4, %v396_v7  ;;  %v407_v14 = vadd.f32 %v394_v8, %v370_v60  ;;  %v442_v15 = vadd.f32 %v441_v11, %v438_v9  ;;  %v446_v16 = vmul.f32 %v730_v6, %v445_v12  ;;  %v450_v17 = vstv %s841_s13 }
  0x3f   : > { %596 = vst.msk [vmem:[%s725_s25 + $0x78] sm:$0xff] %vm302_vm4, %v396_v7  ;;  %597 = vst.msk [vmem:[%s725_s25 + $0x80] sm:$0xff] %vm302_vm4, %v396_v7  ;;  %v451_v18 = vmul.f32 %v718_v4, %v450_v17  ;;  %v454_v19 = vstv %s846_s16  ;;  %v461_v20 = vmul.f32 %v740_v13, %v434_v10 }
  0x40   : > { %598 = vst.msk [vmem:[%s725_s25 + $0x88] sm:$0xff] %vm302_vm4, %v396_v7  ;;  %599 = vst.msk [vmem:[%s725_s25 + $0x90] sm:$0xff] %vm302_vm4, %v396_v7  ;;  %v447_v21 = vadd.f32 %v446_v16, %v442_v15  ;;  %v458_v22 = vstv %s850_s18 }
  0x41   : > { %600 = vst.msk [vmem:[%s725_s25 + $0x98] sm:$0xff] %vm302_vm4, %v396_v7  ;;  %601 = vst.msk [vmem:[%s725_s25 + $0xa0] sm:$0xff] %vm302_vm4, %v396_v7  ;;  %v455_v23 = vadd.f32 %v454_v19, %v451_v18  ;;  %v459_v24 = vmul.f32 %v730_v6, %v458_v22 }
  0x42   : > { %602 = vst.msk [vmem:[%s725_s25 + $0xa8] sm:$0xff] %vm302_vm4, %v396_v7  ;;  %603 = vst.msk [vmem:[%s725_s25 + $0xb0] sm:$0xff] %vm302_vm4, %v396_v7  ;;  %v474_v25 = vadd.f32 %v461_v20, %v447_v21  ;;  %v475_v4 = vadd.f32 %v447_v21, %v434_v10 }
  0x43   : > { %604 = vst.msk [vmem:[%s725_s25 + $0xb8] sm:$0xff] %vm302_vm4, %v396_v7  ;;  %605 = vst.msk [vmem:[%s725_s25 + $0xc0] sm:$0xff] %vm302_vm4, %v396_v7  ;;  %v460_v26 = vadd.f32 %v459_v24, %v455_v23 }
  0x44   : > { %606 = vst.msk [vmem:[%s725_s25 + $0xc8] sm:$0xf] %vm315_vm5, %v407_v14 }
  0x45   : > { %v500_v27 = vadd.f32 %v474_v25, %v460_v26  ;;  %v501_v13 = vadd.f32 %v475_v4, %v460_v26  ;;  %v499_v28 = vmul.f32 %v768_v29, %v460_v26 }
  0x47   : > { %607 = vst.msk [vmem:[%s725_s25 + $0xd0] sm:$0xff] %vm302_vm4, %v500_v27  ;;  %608 = vst.msk [vmem:[%s725_s25 + $0xd8] sm:$0xff] %vm302_vm4, %v501_v13  ;;  %v512_v6 = vadd.f32 %v499_v28, %v475_v4 }
  0x48   : > { %609 = vst.msk [vmem:[%s725_s25 + $0xe0] sm:$0xff] %vm302_vm4, %v501_v13  ;;  %610 = vst.msk [vmem:[%s725_s25 + $0xe8] sm:$0xff] %vm302_vm4, %v501_v13 }
  0x49   : > { %611 = vst.msk [vmem:[%s725_s25 + $0xf0] sm:$0xff] %vm302_vm4, %v501_v13  ;;  %612 = vst.msk [vmem:[%s725_s25 + $0xf8] sm:$0xff] %vm302_vm4, %v501_v13 }
  0x4a   : > { %613 = vst.msk [vmem:[%s725_s25 + $0x100] sm:$0xff] %vm302_vm4, %v501_v13  ;;  %614 = vst.msk [vmem:[%s725_s25 + $0x108] sm:$0xff] %vm302_vm4, %v501_v13 }
  0x4b   : > { %615 = vst.msk [vmem:[%s725_s25 + $0x110] sm:$0xff] %vm302_vm4, %v501_v13  ;;  %616 = vst.msk [vmem:[%s725_s25 + $0x118] sm:$0xff] %vm302_vm4, %v501_v13 }
  0x4c   : > { %617 = vst.msk [vmem:[%s725_s25 + $0x120] sm:$0xff] %vm302_vm4, %v501_v13  ;;  %618 = vst.msk [vmem:[%s725_s25 + $0x128] sm:$0xff] %vm302_vm4, %v501_v13 }
  0x4d   : > { %619 = vst.msk [vmem:[%s725_s25 + $0x130] sm:$0xf] %vm315_vm5, %v512_v6 }
  0x4e PF: > { %s12_s6 = sadd.s32 1, %s668_s6  }
  0x4f   : > { %p9_p1 = scmp.ge.s32.totalorder %s12_s6, 4  }
  0x51   :  { %11 = sbr.rel (!%p9_p1) target bundleno = 1 (0x1), region = 58 }
  0x58   :  { %548 = vsyncpa [#allocation3], 1 }
  0x59   :  { %550 = vsyncpa [#allocation3 + $0x1], 1 }

</bundles_post_ra>
